<compile_context>
chip_gen: v7x
topology: tpu7x:2x2x1
jax: 0.10.0
libtpu: 0.0.40
codegen_flags: <defaults>
</compile_context>

<pallas_src>
import jax
import jax.numpy as jnp
from jax.experimental import pallas as pl
from jax.experimental.pallas import tpu as pltpu

LANE = 128
SUBLANE = 8


def _round_up(x, m):
    return ((x + m - 1) // m) * m


def decoder_a_kernel(z_ref, w1_ref, b1_ref, w2_ref, b2_ref, o_ref):
    z = z_ref[...]
    # Take the low-precision MXU path for fc1 too when weights are bf16
    # (otherwise z(f32) @ w1(bf16) silently promotes w1 back to f32).
    if z.dtype != w1_ref.dtype:
        z = z.astype(w1_ref.dtype)
    # fc1 + ReLU: MXU matmul with f32 accumulation; bias add + ReLU on the VPU.
    h = jnp.dot(z, w1_ref[...], preferred_element_type=jnp.float32)
    h = jnp.maximum(h + b1_ref[...].astype(jnp.float32), 0.0)
    if h.dtype != w2_ref.dtype:
        h = h.astype(w2_ref.dtype)
    # fc2 + Sigmoid.  sigmoid's exp rides the EUP slot (free at these shapes);
    # revisit only if a bundle dump shows the epilogue VALU-bound.
    o = jnp.dot(h, w2_ref[...], preferred_element_type=jnp.float32)
    o = o + b2_ref[...].astype(jnp.float32)
    o_ref[...] = jax.nn.sigmoid(o).astype(o_ref.dtype)


def prepare_decoder_a_params(w1, b1, w2, b2, param_dtype=None):
    """One-time parameter prep — call at init, NOT per forward.

    w1: (input_dim, hidden), b1: (hidden,), w2: (hidden, output_dim), b2: (output_dim,)
    (weights stored as the transpose of PyTorch's (out, in) layout).

    Only the hidden (contraction) dim is padded to a lane multiple; this is
    exact because padded b1 entries are 0 -> ReLU(0)=0 hidden activations meet
    zero W2 rows.  input_dim/output_dim are left at their true widths.
    Pass param_dtype=jnp.bfloat16 on v6e/v7x for full-rate MXU + halved weight
    bytes (accumulation and epilogue stay f32 in the kernel).
    """
    input_dim, hidden = w1.shape
    output_dim = w2.shape[1]
    if param_dtype is not None:
        w1, b1, w2, b2 = (t.astype(param_dtype) for t in (w1, b1, w2, b2))
    hid_p = _round_up(hidden, LANE)
    w1p = jnp.zeros((input_dim, hid_p), w1.dtype).at[:, :hidden].set(w1)
    b1p = jnp.zeros((1, hid_p), b1.dtype).at[0, :hidden].set(b1)
    w2p = jnp.zeros((hid_p, output_dim), w2.dtype).at[:hidden, :].set(w2)
    b2p = b2.reshape(1, output_dim)
    return w1p, b1p, w2p, b2p


def _choose_block_b(B, input_dim, output_dim, act_itemsize):
    """Batch-tile rows sized so each grid step moves ~3 MiB of z+out traffic
    (amortizes fixed per-step overhead), clamped to [256, 2048]."""
    lane = lambda d: max(_round_up(d, LANE), LANE)
    bytes_per_row = (lane(input_dim) + lane(output_dim)) * act_itemsize
    bb = (3 * 1024 * 1024) // bytes_per_row
    bb = max(256, min(2048, int(bb)))
    bb = _round_up(bb, SUBLANE)
    if bb >= B:
        # Single full-batch tile: block dim equals the array dim, so no
        # sublane-divisibility requirement and no padding.
        return B
    # Keep >= 2 tiles so the "parallel" axis has work for both v7x TensorCores.
    if pl.cdiv(B, bb) < 2:
        bb = _round_up(pl.cdiv(B, 2), SUBLANE)
    return bb


def _vmem_limit_bytes(block_b, input_dim, hid_p, output_dim, w_itemsize, act_itemsize):
    lane = lambda d: max(_round_up(d, LANE), LANE)
    sub = lambda d: max(_round_up(d, SUBLANE), SUBLANE)
    bb = max(_round_up(block_b, SUBLANE), SUBLANE)
    # Single-buffered resident weights + biases.
    weights = (sub(input_dim) * hid_p + hid_p * lane(output_dim)
               + SUBLANE * hid_p + SUBLANE * lane(output_dim)) * w_itemsize
    # Double-buffered z / out tiles.
    io = 2 * bb * (lane(input_dim) + lane(output_dim)) * act_itemsize
    # f32 intermediates (h, pre-sigmoid o).
    interm = bb * (hid_p + lane(output_dim)) * 4
    need = int((weights + io + interm) * 1.4) + (4 << 20)   # compiler scratch headroom
    try:
        cap = getattr(pltpu.get_tpu_info(), "vmem_capacity_bytes", 64 << 20)
    except Exception:  # pragma: no cover - non-TPU / older API
        cap = 64 << 20
    return max(16 << 20, min(need, int(cap * 0.85)))


def decoder_a_forward(z, params, *, block_b=None):
    """z: (B, input_dim); params = prepare_decoder_a_params(...) output."""
    w1p, b1p, w2p, b2p = params
    B, input_dim = z.shape
    hid_p = w1p.shape[1]
    output_dim = w2p.shape[1]

    if block_b is None:
        block_b = _choose_block_b(B, input_dim, output_dim, z.dtype.itemsize)
    block_b = min(block_b, B)
    if block_b < B:
        block_b = _round_up(block_b, SUBLANE)

    grid = (pl.cdiv(B, block_b),)   # partial last tile is masked by Pallas

    # Constant-index operands stay resident across the grid -> single-buffer
    # them to halve their VMEM footprint.
    resident = dict(pipeline_mode=pl.Buffered(1))

    vmem_limit = _vmem_limit_bytes(block_b, input_dim, hid_p, output_dim,
                                   w1p.dtype.itemsize, z.dtype.itemsize)

    out = pl.pallas_call(
        decoder_a_kernel,
        out_shape=jax.ShapeDtypeStruct((B, output_dim), z.dtype),
        grid_spec=pltpu.PrefetchScalarGridSpec(
            num_scalar_prefetch=0,
            grid=grid,
            in_specs=[
                pl.BlockSpec((block_b, input_dim), lambda i: (i, 0)),            # z tile
                pl.BlockSpec((input_dim, hid_p), lambda i: (0, 0), **resident),  # W1
                pl.BlockSpec((1, hid_p), lambda i: (0, 0), **resident),          # b1
                pl.BlockSpec((hid_p, output_dim), lambda i: (0, 0), **resident), # W2
                pl.BlockSpec((1, output_dim), lambda i: (0, 0), **resident),     # b2
            ],
            out_specs=pl.BlockSpec((block_b, output_dim), lambda i: (i, 0)),
        ),
        compiler_params=pltpu.CompilerParams(
            dimension_semantics=("parallel",),   # batch tiles shard across TCs
            vmem_limit_bytes=vmem_limit,
        ),
    )(z, w1p, b1p, w2p, b2p)
    return out


if __name__ == "__main__":
    # Small shapes consistent with the module's forward:
    # z: (batch, input_dim); fc1: input_dim -> hidden; fc2: hidden -> output_dim.
    batch, input_dim, hidden, output_dim = 8, 16, 32, 24

    key = jax.random.PRNGKey(0)
    kz, kw1, kb1, kw2, kb2 = jax.random.split(key, 5)

    z = jax.random.normal(kz, (batch, input_dim), dtype=jnp.float32)
    # Deterministic synthetic parameters (PyTorch-style uniform init scale),
    # stored (in_features, out_features) = transpose of PyTorch's weight.
    w1 = jax.random.uniform(kw1, (input_dim, hidden), minval=-1.0, maxval=1.0,
                            dtype=jnp.float32) / jnp.sqrt(input_dim)
    b1 = jax.random.uniform(kb1, (hidden,), minval=-1.0, maxval=1.0,
                            dtype=jnp.float32) / jnp.sqrt(input_dim)
    w2 = jax.random.uniform(kw2, (hidden, output_dim), minval=-1.0, maxval=1.0,
                            dtype=jnp.float32) / jnp.sqrt(hidden)
    b2 = jax.random.uniform(kb2, (output_dim,), minval=-1.0, maxval=1.0,
                            dtype=jnp.float32) / jnp.sqrt(hidden)

    # One-time parameter prep (not per forward call).
    params = prepare_decoder_a_params(w1, b1, w2, b2)

    out = decoder_a_forward(z, params)
    out = jax.block_until_ready(out)

    # Pure-JAX reference of the same forward pass.
    ref = jax.nn.sigmoid(jnp.maximum(z @ w1 + b1, 0.0) @ w2 + b2)
    assert out.shape == (batch, output_dim)
    assert jnp.allclose(out, ref, atol=1e-5, rtol=1e-5)

    print("KERNEL_OK")
</pallas_src>

<mosaic_0001>
module attributes {stable_mosaic.version = 11 : i64} {
  func.func @decoder_a_kernel(%arg0: i32, %arg1: memref<8x16xf32, #tpu.memory_space<vmem>>, %arg2: memref<16x128xf32, #tpu.memory_space<vmem>>, %arg3: memref<1x128xf32, #tpu.memory_space<vmem>>, %arg4: memref<128x24xf32, #tpu.memory_space<vmem>>, %arg5: memref<1x24xf32, #tpu.memory_space<vmem>>, %arg6: memref<8x24xf32, #tpu.memory_space<vmem>>) attributes {dimension_semantics = [#tpu.dimension_semantics<parallel>], iteration_bounds = array<i64: 1>, scalar_prefetch = 0 : i64, scratch_operands = 0 : i64, tpu.core_type = #tpu.core_type<tc>, window_params = [{transform_indices = @transform_0, window_bounds = array<i64: 8, 16>}, {pipeline_mode = #tpu.pipeline_mode<synchronous>, transform_indices = @transform_1, window_bounds = array<i64: 16, 128>}, {pipeline_mode = #tpu.pipeline_mode<synchronous>, transform_indices = @transform_2, window_bounds = array<i64: 1, 128>}, {pipeline_mode = #tpu.pipeline_mode<synchronous>, transform_indices = @transform_3, window_bounds = array<i64: 128, 24>}, {pipeline_mode = #tpu.pipeline_mode<synchronous>, transform_indices = @transform_4, window_bounds = array<i64: 1, 24>}, {transform_indices = @transform_5, window_bounds = array<i64: 8, 24>}]} {
    %c0 = arith.constant 0 : index
    %c0_0 = arith.constant 0 : index
    %0 = vector.load %arg1[%c0, %c0_0] : memref<8x16xf32, #tpu.memory_space<vmem>>, vector<8x16xf32>
    %c0_1 = arith.constant 0 : index
    %c0_2 = arith.constant 0 : index
    %1 = vector.load %arg2[%c0_1, %c0_2] : memref<16x128xf32, #tpu.memory_space<vmem>>, vector<16x128xf32>
    %cst = arith.constant dense<0.000000e+00> : vector<8x128xf32>
    %2 = tpu.matmul %0, %1, %cst {dimension_numbers = #tpu.dot_dimension_numbers<[1], [0], [0], [1], [0, 0, 1, 1], [], []>} : vector<8x16xf32>, vector<16x128xf32>, vector<8x128xf32> -> vector<8x128xf32>
    %c0_3 = arith.constant 0 : index
    %c0_4 = arith.constant 0 : index
    %3 = vector.load %arg3[%c0_3, %c0_4] : memref<1x128xf32, #tpu.memory_space<vmem>>, vector<1x128xf32>
    %4 = vector.broadcast %3 : vector<1x128xf32> to vector<8x128xf32>
    %5 = arith.addf %2, %4 : vector<8x128xf32>
    %cst_5 = arith.constant 0.000000e+00 : f32
    %6 = vector.broadcast %cst_5 : f32 to vector<8x128xf32>
    %7 = arith.maximumf %5, %6 : vector<8x128xf32>
    %c0_6 = arith.constant 0 : index
    %c0_7 = arith.constant 0 : index
    %8 = vector.load %arg4[%c0_6, %c0_7] : memref<128x24xf32, #tpu.memory_space<vmem>>, vector<128x24xf32>
    %cst_8 = arith.constant dense<0.000000e+00> : vector<8x24xf32>
    %9 = tpu.matmul %7, %8, %cst_8 {dimension_numbers = #tpu.dot_dimension_numbers<[1], [0], [0], [1], [0, 0, 1, 1], [], []>} : vector<8x128xf32>, vector<128x24xf32>, vector<8x24xf32> -> vector<8x24xf32>
    %c0_9 = arith.constant 0 : index
    %c0_10 = arith.constant 0 : index
    %10 = vector.load %arg5[%c0_9, %c0_10] : memref<1x24xf32, #tpu.memory_space<vmem>>, vector<1x24xf32>
    %11 = vector.broadcast %10 : vector<1x24xf32> to vector<8x24xf32>
    %12 = arith.addf %9, %11 : vector<8x24xf32>
    %13 = arith.negf %12 : vector<8x24xf32>
    %14 = math.exp %13 : vector<8x24xf32>
    %cst_11 = arith.constant 1.000000e+00 : f32
    %15 = vector.broadcast %cst_11 : f32 to vector<8x24xf32>
    %16 = arith.addf %15, %14 : vector<8x24xf32>
    %17 = arith.divf %15, %16 : vector<8x24xf32>
    %c0_12 = arith.constant 0 : index
    %c0_13 = arith.constant 0 : index
    %18 = vector.load %arg6[%c0_12, %c0_13] : memref<8x24xf32, #tpu.memory_space<vmem>>, vector<8x24xf32>
    tpu.vector_store %arg6[%c0_12, %c0_13], %17 {strides = array<i32>} : memref<8x24xf32, #tpu.memory_space<vmem>>, vector<8x24xf32>,
    return
  }
  func.func @transform_0(%arg0: i32) -> (i32, i32) {
    %c0_i32 = arith.constant 0 : i32
    %c0_i32_0 = arith.constant 0 : i32
    return %arg0, %c0_i32 : i32, i32
  }
  func.func @transform_1(%arg0: i32) -> (i32, i32) {
    %c0_i32 = arith.constant 0 : i32
    %c0_i32_0 = arith.constant 0 : i32
    %c0_i32_1 = arith.constant 0 : i32
    return %c0_i32, %c0_i32_0 : i32, i32
  }
  func.func @transform_2(%arg0: i32) -> (i32, i32) {
    %c0_i32 = arith.constant 0 : i32
    %c0_i32_0 = arith.constant 0 : i32
    %c0_i32_1 = arith.constant 0 : i32
    return %c0_i32, %c0_i32_0 : i32, i32
  }
  func.func @transform_3(%arg0: i32) -> (i32, i32) {
    %c0_i32 = arith.constant 0 : i32
    %c0_i32_0 = arith.constant 0 : i32
    %c0_i32_1 = arith.constant 0 : i32
    return %c0_i32, %c0_i32_0 : i32, i32
  }
  func.func @transform_4(%arg0: i32) -> (i32, i32) {
    %c0_i32 = arith.constant 0 : i32
    %c0_i32_0 = arith.constant 0 : i32
    %c0_i32_1 = arith.constant 0 : i32
    return %c0_i32, %c0_i32_0 : i32, i32
  }
  func.func @transform_5(%arg0: i32) -> (i32, i32) {
    %c0_i32 = arith.constant 0 : i32
    %c0_i32_0 = arith.constant 0 : i32
    return %arg0, %c0_i32 : i32, i32
  }
}

</mosaic_0001>

<bundles_post_ra>
// kernel: tpu_custom_call.1
= control target key start
LH: loop header
LB: loop body
LE: loop exit
PB: predicated region body
PF: predicated region fallthrough
CT: control target
= control target key end

     0   :  { %v346_v2 = vmov 0.0|0.0   ;;  %vm347_vm0 = vmmov 0   ;;  %v348_v4 = vmov 0.0   ;;  %vm31_vm1 = vcmask 130048   ;;  %s455_s0 = inlined_call_operand.vmem [shape: f32[8,16], index: 0, kind: input, shape index: {}]   ;;  %s456_s1 = inlined_call_operand.vmem [shape: f32[16,128], index: 1, kind: input, shape index: {}]   ;;  %s457_s2 = inlined_call_operand.vmem [shape: f32[1,128], index: 2, kind: input, shape index: {}]   ;;  %s458_s3 = inlined_call_operand.vmem [shape: f32[128,24], index: 3, kind: input, shape index: {}]   ;;  %s459_s4 = inlined_call_operand.vmem [shape: f32[1,24], index: 4, kind: input, shape index: {}]   ;;  %s460_s5 = inlined_call_operand.hbm [shape: f32[8,24], index: 5, kind: output, shape index: {}]  }
   0x1   :  { %v22_v0 = vld [vmem:[%s456_s1] sm:$0xff]  ;;  %v23_v1 = vld [vmem:[%s456_s1 + $0x8] sm:$0xff]  ;;  %287 = vmatprep.subr.bf16.mxu0 %v346_v2  ;;  %249 = vmatprep.mubr.msk.f32.mxu0 %vm347_vm0, %v348_v4  ;;  %v108_v7 = vld [vmem:[%s458_s3 + $0x10] sm:$0xff] }
   0x2   :  { %v288_v3 = vpack.c.bf16 %v23_v1, %v22_v0  ;;  %v106_v5 = vld [vmem:[%s458_s3] sm:$0xff]  ;;  %v107_v6 = vld [vmem:[%s458_s3 + $0x8] sm:$0xff]  ;;  %290 = vmatprep.subr.bf16.mxu1 %v346_v2  ;;  %v109_v9 = vld [vmem:[%s458_s3 + $0x18] sm:$0xff]  ;;  %284 = vmatprep.mubr.msk.f32.mxu1 %vm347_vm0, %v348_v4 }
   0x3   :  { %v291_v8 = vpack.c.bf16 %v107_v6, %v106_v5  ;;  %v21_v10 = vld [vmem:[%s455_s0] sm:$0xff]  ;;  %v294_v11 = vpack.c.bf16 %v109_v9, %v108_v7  ;;  %v111_v13 = vld [vmem:[%s458_s3 + $0x28] sm:$0xff] }
   0x4   :  { %289 = vmatpush3.bf16.msra.mxu0 %v288_v3  ;;  %v110_v12 = vld [vmem:[%s458_s3 + $0x20] sm:$0xff] }
   0x5   :  { %292 = vmatpush3.bf16.msra.mxu1 %v291_v8 }
   0x6   :  { %293 = vmatprep.subr.bf16.mxu1 %v346_v2 }
   0x7   :  { %250 = vmatmul.mubr.msk.f32.vlgmr.msra.gmra.mrb[0].mxu0 %vm31_vm1, %v21_v10 }
   0x8   :  { %10 = vsyncpa [#allocation3], 0  ;;  %v297_v14 = vpack.c.bf16 %v111_v13, %v110_v12  ;;  %v112_v15 = vld [vmem:[%s458_s3 + $0x30] sm:$0xff]  ;;  %v113_v16 = vld [vmem:[%s458_s3 + $0x38] sm:$0xff]  ;;  %vm205_vm2 = vcmask 195584  }
   0x9   :  { %295 = vmatpush3.bf16.msra.mxu1 %v294_v11  ;;  %v300_v17 = vpack.c.bf16 %v113_v16, %v112_v15  ;;  %v114_v18 = vld [vmem:[%s458_s3 + $0x40] sm:$0xff]  ;;  %v115_v19 = vld [vmem:[%s458_s3 + $0x48] sm:$0xff]  ;;  %v116_v21 = vld [vmem:[%s458_s3 + $0x50] sm:$0xff] }
   0xa   :  { %296 = vmatprep.subr.bf16.mxu1 %v346_v2  ;;  %v303_v20 = vpack.c.bf16 %v115_v19, %v114_v18  ;;  %v117_v22 = vld [vmem:[%s458_s3 + $0x58] sm:$0xff]  ;;  %v118_v24 = vld [vmem:[%s458_s3 + $0x60] sm:$0xff]  ;;  %v119_v25 = vld [vmem:[%s458_s3 + $0x68] sm:$0xff] }
   0xb   :  { %v306_v23 = vpack.c.bf16 %v117_v22, %v116_v21  ;;  %v309_v26 = vpack.c.bf16 %v119_v25, %v118_v24  ;;  %v120_v27 = vld [vmem:[%s458_s3 + $0x70] sm:$0xff]  ;;  %v121_v28 = vld [vmem:[%s458_s3 + $0x78] sm:$0xff]  ;;  %v221_v30 = vld [vmem:[%s457_s2] ss:$0 sm:$0xff]  ;;  %s349_s3 = smov [#allocation2]  }
   0xc   :  { %v312_v29 = vpack.c.bf16 %v121_v28, %v120_v27  ;;  %v223_v35 = vld [vmem:[%s459_s4] ss:$0 sm:$0xff]  ;;  %s213_s7 = sshll.u32 %s349_s3, 4  ;;  %s214_s7 = int_to_ptr.vmem [resolvable:$true] %s213_s7 }
   0xd   :  { %298 = vmatpush3.bf16.msra.mxu1 %v297_v14  ;;  %s322_s2 = scalar_lea.vmem %s214_s7, 128  ;;  %p327_p1 = scmp.lt.s32.totalorder %s214_s7, %s214_s7 }
   0xe   :  { %299 = vmatprep.subr.bf16.mxu1 %v346_v2  ;;  %p323_p0 = scmp.ne.s32.totalorder %s214_s7, %s322_s2  ;;  %p328_p2 = scmp.lt.s32.totalorder %s322_s2, %s322_s2 }
  0x10   :  { %p329_p3 = por %p328_p2, %p327_p1 }
  0x11   :  { %301 = vmatpush3.bf16.msra.mxu1 %v300_v17 }
  0x12   :  { %302 = vmatprep.subr.bf16.mxu1 %v346_v2  ;;  %p330_p4 = pnand %p329_p3, %p323_p0 }
  0x15   :  { %304 = vmatpush3.bf16.msra.mxu1 %v303_v20 }
  0x16   :  { %305 = vmatprep.subr.bf16.mxu1 %v346_v2 }
  0x19   :  { %307 = vmatpush3.bf16.msra.mxu1 %v306_v23 }
  0x1a   :  { %308 = vmatprep.subr.bf16.mxu1 %v346_v2 }
  0x1d   :  { %310 = vmatpush3.bf16.msra.mxu1 %v309_v26 }
  0x1e   :  { %311 = vmatprep.subr.bf16.mxu1 %v346_v2 }
  0x21   :  { %313 = vmatpush3.bf16.msra.mxu1 %v312_v29 }
  0xda   :  { %v101_v31 = vpop.f32.mrb[0].mxu0 }
  0xdb   :  { %v102_v32 = vadd.f32 %v221_v30, %v101_v31  ;;  %v251_v33 = vpop.f32.mrb[1].mxu0 }
  0xdd   :  { %v105_v34 = vmax.f32 %v102_v32, 0.0 }
  0xdf   :  { %285 = vmatmul.mubr.f32.vlgmr.msra.gmra.mrb[0].mxu1 %v105_v34 }
 0x1b2   :  { %v195_v36 = vpop.f32.mrb[0].mxu1 }
 0x1b3   :  { %v196_v37 = vadd.f32 %v223_v35, %v195_v36  ;;  %v286_v38 = vpop.f32.mrb[1].mxu1 }
 0x1b5   :  { %v224_v39 = vmul.f32 -1.442695, %v196_v37 }
 0x1b7   :  { %318 = vpow2.f32 %v224_v39 }
 0x1c1   :  { %v319_v40 = vpop.eup %318 }
 0x1c2   :  { %v202_v41 = vadd.f32 1.0, %v319_v40 }
 0x1c4   :  { %320 = vrcp.f32 %v202_v41 }
 0x1ce   :  { %v321_v42 = vpop.eup %320 }
 0x1cf   :  { %206 = vst.msk [vmem:[#allocation2] sm:$0xff] %vm205_vm2, %v321_v42 }
 0x1d0   :  { %333 = shalt.err (!%p330_p4)
}
 0x1d1   :  { %s334_s9 = scalar_lea.hbm %s460_s5, 128 }
 0x1d2   :  { %p335_p5 = scmp.ne.s32.totalorder %s460_s5, %s334_s9  ;;  %p338_p6 = scmp.lt.u32.totalorder %s334_s9, %s460_s5 }
 0x1d4   :  { %p340_p7 = pnand %p338_p6, %p335_p5 }
 0x1d6   :  { %343 = shalt.err (!%p340_p7)
}
 0x1d7   :  { %216 = dma.vmem_to_hbm [thread:$0]  %s214_s7, 128, %s460_s5, [#allocation3]  }
 0x1d8   :  { %344 = dma.done.wait [#allocation3], 128  }
 0x1d9   :  { %345 = vsyncadd [#allocation3], 4294967168 }
 0x1da   :  { %220 = vsyncpa [#allocation3], 1 }

</bundles_post_ra>
